<compile_context>
chip_gen: v5e
topology: v5e:2x2
jax: 0.10.0
libtpu: 0.0.40
codegen_flags: <defaults>
</compile_context>

<pallas_src>
import functools

import jax
import jax.numpy as jnp
import numpy as np
from jax.experimental import pallas as pl
from jax.experimental.pallas import tpu as pltpu


def _round_up(x, m):
    return ((x + m - 1) // m) * m


def _pad2(x, rows, cols, fill):
    """Pad a 2-D array to (rows, cols) with `fill`, copy-free when already sized."""
    r0, c0 = x.shape
    if r0 == rows and c0 == cols:
        return x
    out = jnp.full((rows, cols), fill, x.dtype)
    return out.at[:r0, :c0].set(x)


def clce_kernel(yc_ref, yr_ref, nneg_ref, er_ref, ect_ref, out_ref,
                m_run, s_run, jmin_run, pos_run, *, tau, n):
    i = pl.program_id(0)
    j = pl.program_id(1)
    nj = pl.num_programs(1)
    tm = er_ref.shape[0]
    tn = ect_ref.shape[1]

    # ---- init running state at the first column tile of each row tile ----
    @pl.when(j == 0)
    def _():
        m_run[...] = jnp.full(m_run.shape, -1e30, jnp.float32)
        s_run[...] = jnp.zeros(s_run.shape, jnp.float32)
        jmin_run[...] = jnp.full(jmin_run.shape, n, jnp.int32)
        pos_run[...] = jnp.zeros(pos_run.shape, jnp.float32)

    # ---- (tm, tn) tile of scaled cosine similarities (one MXU matmul) ----
    cos = jnp.dot(er_ref[...], ect_ref[...], preferred_element_type=jnp.float32)
    half_tau = jnp.float32(0.5 * tau)
    scaled = cos * half_tau + half_tau            # (cos + 1) * 0.5 * tau

    # Vector-shaped index/label helpers; broadcasting expands them lazily in
    # the compares instead of materializing two full-tile iotas.
    gr = i * tm + jax.lax.broadcasted_iota(jnp.int32, (tm, 1), 0)   # (tm, 1)
    gc = j * tn + jax.lax.broadcasted_iota(jnp.int32, (1, tn), 1)   # (1, tn)
    yc = yc_ref[...]                               # (tm, 1) int32 (pad rows: -1)
    yr = yr_ref[...]                               # (1, tn) int32 (pad cols: -2)
    valid = yr >= 0                                # padding mask from labels
    eq = yc == yr                                  # (tm, tn); false for padded cols
    same = eq & (gr != gc)                         # candidate positives
    diff = jnp.logical_not(eq) & valid             # negatives

    # ---- first positive (smallest global column), carried across tiles ----
    cand = jnp.where(same, gc, jnp.int32(n))                          # (tm, tn)
    blk_jmin = jnp.min(cand, axis=1, keepdims=True)                   # (tm, 1)
    # Reuse cand: when the tile has no positive, cand==blk_jmin is all-true and
    # blk_pos is garbage, but `take` below is False so it is discarded.
    blk_pos = jnp.sum(jnp.where(cand == blk_jmin, scaled, 0.0),
                      axis=1, keepdims=True)                          # (tm, 1)
    take = blk_jmin < jmin_run[...]
    pos_run[...] = jnp.where(take, blk_pos, pos_run[...])
    jmin_run[...] = jnp.minimum(jmin_run[...], blk_jmin)

    # ---- online (flash-style) logsumexp over the negatives ----
    neg = jnp.where(diff, scaled, -jnp.inf)        # single masked tensor
    blk_max = jnp.max(neg, axis=1, keepdims=True)
    m_old = m_run[...]
    m_new = jnp.maximum(m_old, blk_max)            # never -inf (init -1e30)
    s_run[...] = (s_run[...] * jnp.exp(m_old - m_new)
                  + jnp.sum(jnp.exp(neg - m_new), axis=1, keepdims=True))
    m_run[...] = m_new

    # ---- finalize: combine positive slot, negatives and the zero slots ----
    @pl.when(j == nj - 1)
    def _():
        pos_val = pos_run[...]
        m_neg = m_run[...]
        s_neg = s_run[...]
        zeros_cnt = jnp.float32(2 * n - 2) - nneg_ref[...]            # (tm, 1)
        m_all = jnp.maximum(jnp.maximum(m_neg, pos_val), 0.0)
        sum_all = (s_neg * jnp.exp(m_neg - m_all)
                   + jnp.exp(pos_val - m_all)
                   + zeros_cnt * jnp.exp(-m_all))
        out_ref[...] = (m_all + jnp.log(sum_all)) - pos_val           # -logsoftmax[0]


def clce_loss(layer_embeds, y_true, y_pred, *, tau, lambd,
              row_tile=512, col_tile=512, vmem_limit_bytes=48 * 1024 * 1024):
    n, d = layer_embeds.shape
    c = y_pred.shape[1]
    eps = jnp.float32(1e-8)

    # Normalize embeddings once (per-vector eps clamp, as in F.cosine_similarity);
    # keep the caller's dtype so bf16 inputs hit the bf16 MXU path.
    e32 = layer_embeds.astype(jnp.float32)
    inv = jax.lax.rsqrt(jnp.maximum(jnp.sum(e32 * e32, axis=1, keepdims=True),
                                    eps * eps))
    en = (e32 * inv).astype(layer_embeds.dtype)          # (n, d)
    ent = en.T                                           # (d, n) MXU-friendly RHS

    # Negative count per row from a per-class histogram (no N^2 pass).
    y = y_true.astype(jnp.int32)
    counts = jnp.zeros((c,), jnp.float32).at[y].add(1.0)
    num_neg = (jnp.float32(n) - counts[y]).reshape(n, 1)

    # Tile sizes: biggest that fits comfortably; clamp for small n.
    tm = min(row_tile, _round_up(n, 8))
    tn = min(col_tile, _round_up(n, 128))
    npr = _round_up(n, tm)
    npc = _round_up(n, tn)

    # Pad to tile multiples (no-ops when n is already a multiple).  Padded
    # columns are masked in-kernel via the -2 label; padded rows are dropped
    # by the wrapper slice below.
    en_p = _pad2(en, npr, d, jnp.zeros((), en.dtype))
    ent_p = _pad2(ent, d, npc, jnp.zeros((), ent.dtype))
    yc = _pad2(y.reshape(n, 1), npr, 1, jnp.int32(-1))
    yr = _pad2(y.reshape(1, n), 1, npc, jnp.int32(-2))
    nneg = _pad2(num_neg, npr, 1, jnp.float32(0))

    grid = (npr // tm, npc // tn)
    row_cl = pl.pallas_call(
        functools.partial(clce_kernel, tau=float(tau), n=n),
        out_shape=jax.ShapeDtypeStruct((npr, 1), jnp.float32),
        grid=grid,
        in_specs=[
            pl.BlockSpec((tm, 1), lambda i, j: (i, 0)),   # labels, column form
            pl.BlockSpec((1, tn), lambda i, j: (0, j)),   # labels, row form
            pl.BlockSpec((tm, 1), lambda i, j: (i, 0)),   # per-row negative count
            pl.BlockSpec((tm, d), lambda i, j: (i, 0)),   # normalized embeds (rows)
            pl.BlockSpec((d, tn), lambda i, j: (0, j)),   # normalized embeds^T (cols)
        ],
        out_specs=pl.BlockSpec((tm, 1), lambda i, j: (i, 0)),
        scratch_shapes=[
            pltpu.VMEM((tm, 1), jnp.float32),   # running max over negatives
            pltpu.VMEM((tm, 1), jnp.float32),   # running sum_exp over negatives
            pltpu.VMEM((tm, 1), jnp.int32),     # running first-positive index
            pltpu.VMEM((tm, 1), jnp.float32),   # running first-positive value
        ],
        compiler_params=pltpu.CompilerParams(
            dimension_semantics=("parallel", "arbitrary"),
            vmem_limit_bytes=vmem_limit_bytes,
        ),
    )(yc, yr, nneg, en_p, ent_p)

    cl = jnp.sum(row_cl[:n, 0]) / jnp.float32(n)

    # Cross-entropy on the classifier logits: tiny (n, C), plain XLA.
    logits = y_pred.astype(jnp.float32)
    lmax = jnp.max(logits, axis=1, keepdims=True)
    lse = lmax[:, 0] + jnp.log(jnp.sum(jnp.exp(logits - lmax), axis=1))
    tgt = jnp.take_along_axis(logits, y[:, None], axis=1)[:, 0]
    ce = jnp.mean(lse - tgt)

    return jnp.float32(lambd) * cl + jnp.float32(1.0 - lambd) * ce


def reference(embeds, y_true, y_pred, tau, lambd):
    """Pure-numpy transcription of the PyTorch loop, for verification."""
    embeds = np.asarray(embeds, np.float64)
    y_pred = np.asarray(y_pred, np.float64)
    y_true = np.asarray(y_true)
    n = embeds.shape[0]
    loss_temp = np.zeros((n, 2 * n - 1), dtype=np.float64)

    def cos(a, b):
        w12 = float(np.sum(a * b))
        w1 = float(np.sum(a * a))
        w2 = float(np.sum(b * b))
        return w12 / np.sqrt(max(w1 * w2, 1e-16))

    for i in range(n):
        indice = 1
        pos = True
        for j in range(n):
            if i == j:
                continue
            if y_true[i] == y_true[j] and pos:
                loss_temp[i, 0] = (cos(embeds[i], embeds[j]) + 1) * 0.5 * tau
                pos = False
            elif y_true[i] != y_true[j]:
                loss_temp[i, indice] = (cos(embeds[i], embeds[j]) + 1) * 0.5 * tau
                indice += 1

    m = loss_temp.max(axis=1, keepdims=True)
    lse = m[:, 0] + np.log(np.exp(loss_temp - m).sum(axis=1))
    cl = np.sum(lse - loss_temp[:, 0]) / n

    lm = y_pred.max(axis=1, keepdims=True)
    lse2 = lm[:, 0] + np.log(np.exp(y_pred - lm).sum(axis=1))
    ce = np.mean(lse2 - y_pred[np.arange(n), y_true])
    return lambd * cl + (1 - lambd) * ce


if __name__ == "__main__":
    tau, lambd = 0.5, 0.3
    key = jax.random.PRNGKey(0)
    k1, k2, k3, k4, k5, k6 = jax.random.split(key, 6)

    # Small case (shapes implied by the module's usage).
    N, D, C = 8, 32, 4
    layer_embeds = jax.random.normal(k1, (N, D), dtype=jnp.float32)
    y_true = jax.random.randint(k2, (N,), 0, C, dtype=jnp.int32)
    y_pred = jax.random.normal(k3, (N, C), dtype=jnp.float32)

    loss = clce_loss(layer_embeds, y_true, y_pred, tau=tau, lambd=lambd)
    loss = jax.block_until_ready(loss)
    ref = reference(np.asarray(layer_embeds), np.asarray(y_true),
                    np.asarray(y_pred), tau, lambd)
    assert np.allclose(float(loss), float(ref), rtol=2e-4, atol=2e-4), (loss, ref)

    # Multi-tile case: exercises the (row, col) grid, the online reductions,
    # the first-positive carry across column tiles, and padding.
    N2, D2, C2 = 200, 64, 7
    e2 = jax.random.normal(k4, (N2, D2), dtype=jnp.float32)
    y2 = jax.random.randint(k5, (N2,), 0, C2, dtype=jnp.int32)
    p2 = jax.random.normal(k6, (N2, C2), dtype=jnp.float32)

    loss2 = clce_loss(e2, y2, p2, tau=tau, lambd=lambd,
                      row_tile=64, col_tile=128)
    loss2 = jax.block_until_ready(loss2)
    ref2 = reference(np.asarray(e2), np.asarray(y2), np.asarray(p2), tau, lambd)
    assert np.allclose(float(loss2), float(ref2), rtol=1e-3, atol=1e-3), (loss2, ref2)

    print("KERNEL_OK")
</pallas_src>

<mosaic_0001>
module attributes {stable_mosaic.version = 11 : i64} {
  func.func @clce_kernel(%arg0: i32, %arg1: i32, %arg2: memref<8x1xi32, #tpu.memory_space<vmem>>, %arg3: memref<1x128xi32, #tpu.memory_space<vmem>>, %arg4: memref<8x1xf32, #tpu.memory_space<vmem>>, %arg5: memref<8x32xf32, #tpu.memory_space<vmem>>, %arg6: memref<32x128xf32, #tpu.memory_space<vmem>>, %arg7: memref<8x1xf32, #tpu.memory_space<vmem>>, %arg8: memref<8x1xf32, #tpu.memory_space<vmem>>, %arg9: memref<8x1xf32, #tpu.memory_space<vmem>>, %arg10: memref<8x1xi32, #tpu.memory_space<vmem>>, %arg11: memref<8x1xf32, #tpu.memory_space<vmem>>) attributes {dimension_semantics = [#tpu.dimension_semantics<parallel>, #tpu.dimension_semantics<arbitrary>], iteration_bounds = array<i64: 1, 1>, scalar_prefetch = 0 : i64, scratch_operands = 4 : i64, tpu.core_type = #tpu.core_type<tc>, window_params = [{transform_indices = @transform_0, window_bounds = array<i64: 8, 1>}, {transform_indices = @transform_1, window_bounds = array<i64: 1, 128>}, {transform_indices = @transform_2, window_bounds = array<i64: 8, 1>}, {transform_indices = @transform_3, window_bounds = array<i64: 8, 32>}, {transform_indices = @transform_4, window_bounds = array<i64: 32, 128>}, {transform_indices = @transform_5, window_bounds = array<i64: 8, 1>}]} {
    %c0_i32 = arith.constant 0 : i32
    %0 = arith.cmpi eq, %arg1, %c0_i32 : i32
    %1 = arith.extui %0 : i1 to i32
    %c0_i32_0 = arith.constant 0 : i32
    %2 = arith.cmpi ne, %1, %c0_i32_0 : i32
    scf.if %2 {
      %cst_39 = arith.constant -1.000000e+30 : f32
      %73 = vector.broadcast %cst_39 : f32 to vector<8x1xf32>
      %c0_40 = arith.constant 0 : index
      %c0_41 = arith.constant 0 : index
      %74 = vector.load %arg8[%c0_40, %c0_41] : memref<8x1xf32, #tpu.memory_space<vmem>>, vector<8x1xf32>
      tpu.vector_store %arg8[%c0_40, %c0_41], %73 {strides = array<i32>} : memref<8x1xf32, #tpu.memory_space<vmem>>, vector<8x1xf32>,
      %cst_42 = arith.constant 0.000000e+00 : f32
      %75 = vector.broadcast %cst_42 : f32 to vector<8x1xf32>
      %c0_43 = arith.constant 0 : index
      %c0_44 = arith.constant 0 : index
      %76 = vector.load %arg9[%c0_43, %c0_44] : memref<8x1xf32, #tpu.memory_space<vmem>>, vector<8x1xf32>
      tpu.vector_store %arg9[%c0_43, %c0_44], %75 {strides = array<i32>} : memref<8x1xf32, #tpu.memory_space<vmem>>, vector<8x1xf32>,
      %c8_i32_45 = arith.constant 8 : i32
      %77 = vector.broadcast %c8_i32_45 : i32 to vector<8x1xi32>
      %c0_46 = arith.constant 0 : index
      %c0_47 = arith.constant 0 : index
      %78 = vector.load %arg10[%c0_46, %c0_47] : memref<8x1xi32, #tpu.memory_space<vmem>>, vector<8x1xi32>
      tpu.vector_store %arg10[%c0_46, %c0_47], %77 {strides = array<i32>} : memref<8x1xi32, #tpu.memory_space<vmem>>, vector<8x1xi32>,
      %cst_48 = arith.constant 0.000000e+00 : f32
      %79 = vector.broadcast %cst_48 : f32 to vector<8x1xf32>
      %c0_49 = arith.constant 0 : index
      %c0_50 = arith.constant 0 : index
      %80 = vector.load %arg11[%c0_49, %c0_50] : memref<8x1xf32, #tpu.memory_space<vmem>>, vector<8x1xf32>
      tpu.vector_store %arg11[%c0_49, %c0_50], %79 {strides = array<i32>} : memref<8x1xf32, #tpu.memory_space<vmem>>, vector<8x1xf32>,
    } else {
    }
    %c0 = arith.constant 0 : index
    %c0_1 = arith.constant 0 : index
    %3 = vector.load %arg5[%c0, %c0_1] : memref<8x32xf32, #tpu.memory_space<vmem>>, vector<8x32xf32>
    %c0_2 = arith.constant 0 : index
    %c0_3 = arith.constant 0 : index
    %4 = vector.load %arg6[%c0_2, %c0_3] : memref<32x128xf32, #tpu.memory_space<vmem>>, vector<32x128xf32>
    %cst = arith.constant dense<0.000000e+00> : vector<8x128xf32>
    %5 = tpu.matmul %3, %4, %cst {dimension_numbers = #tpu.dot_dimension_numbers<[1], [0], [0], [1], [0, 0, 1, 1], [], []>} : vector<8x32xf32>, vector<32x128xf32>, vector<8x128xf32> -> vector<8x128xf32>
    %cst_4 = arith.constant 2.500000e-01 : f32
    %6 = vector.broadcast %cst_4 : f32 to vector<8x128xf32>
    %7 = arith.mulf %5, %6 : vector<8x128xf32>
    %cst_5 = arith.constant 2.500000e-01 : f32
    %8 = vector.broadcast %cst_5 : f32 to vector<8x128xf32>
    %9 = arith.addf %7, %8 : vector<8x128xf32>
    %c8_i32 = arith.constant 8 : i32
    %10 = arith.muli %arg0, %c8_i32 : i32
    %11 = tpu.iota {dimensions = array<i32: 0>} : vector<8x1xi32>
    %12 = vector.broadcast %10 : i32 to vector<8x1xi32>
    %13 = arith.addi %12, %11 : vector<8x1xi32>
    %c128_i32 = arith.constant 128 : i32
    %14 = arith.muli %arg1, %c128_i32 : i32
    %15 = tpu.iota {dimensions = array<i32: 1>} : vector<1x128xi32>
    %16 = vector.broadcast %14 : i32 to vector<1x128xi32>
    %17 = arith.addi %16, %15 : vector<1x128xi32>
    %c0_6 = arith.constant 0 : index
    %c0_7 = arith.constant 0 : index
    %18 = vector.load %arg2[%c0_6, %c0_7] : memref<8x1xi32, #tpu.memory_space<vmem>>, vector<8x1xi32>
    %c0_8 = arith.constant 0 : index
    %c0_9 = arith.constant 0 : index
    %19 = vector.load %arg3[%c0_8, %c0_9] : memref<1x128xi32, #tpu.memory_space<vmem>>, vector<1x128xi32>
    %c0_i32_10 = arith.constant 0 : i32
    %20 = vector.broadcast %c0_i32_10 : i32 to vector<1x128xi32>
    %21 = arith.cmpi sge, %19, %20 : vector<1x128xi32>
    %22 = vector.broadcast %18 : vector<8x1xi32> to vector<8x128xi32>
    %23 = vector.broadcast %19 : vector<1x128xi32> to vector<8x128xi32>
    %24 = arith.cmpi eq, %22, %23 : vector<8x128xi32>
    %25 = vector.broadcast %13 : vector<8x1xi32> to vector<8x128xi32>
    %26 = vector.broadcast %17 : vector<1x128xi32> to vector<8x128xi32>
    %27 = arith.cmpi ne, %25, %26 : vector<8x128xi32>
    %28 = arith.andi %24, %27 : vector<8x128xi1>
    %cst_11 = arith.constant dense<true> : vector<8x128xi1>
    %29 = arith.xori %24, %cst_11 : vector<8x128xi1>
    %30 = vector.broadcast %21 : vector<1x128xi1> to vector<8x128xi1>
    %31 = arith.andi %29, %30 : vector<8x128xi1>
    %c8_i32_12 = arith.constant 8 : i32
    %32 = vector.shape_cast %17 : vector<1x128xi32> to vector<1x128xi32>
    %33 = vector.broadcast %32 : vector<1x128xi32> to vector<8x128xi32>
    %34 = vector.broadcast %c8_i32_12 : i32 to vector<8x128xi32>
    %35 = arith.select %28, %33, %34 : vector<8x128xi1>, vector<8x128xi32>
    %cst_13 = arith.constant dense<2147483647> : vector<8xi32>
    %36 = vector.multi_reduction <minsi>, %35, %cst_13 [1] : vector<8x128xi32> to vector<8xi32>
    %37 = vector.shape_cast %36 : vector<8xi32> to vector<8x1xi32>
    %38 = vector.broadcast %37 : vector<8x1xi32> to vector<8x128xi32>
    %39 = arith.cmpi eq, %35, %38 : vector<8x128xi32>
    %cst_14 = arith.constant 0.000000e+00 : f32
    %40 = vector.broadcast %cst_14 : f32 to vector<8x128xf32>
    %41 = arith.select %39, %9, %40 : vector<8x128xi1>, vector<8x128xf32>
    %cst_15 = arith.constant dense<0.000000e+00> : vector<8xf32>
    %42 = vector.multi_reduction <add>, %41, %cst_15 [1] : vector<8x128xf32> to vector<8xf32>
    %43 = vector.shape_cast %42 : vector<8xf32> to vector<8x1xf32>
    %c0_16 = arith.constant 0 : index
    %c0_17 = arith.constant 0 : index
    %44 = vector.load %arg10[%c0_16, %c0_17] : memref<8x1xi32, #tpu.memory_space<vmem>>, vector<8x1xi32>
    %45 = arith.cmpi slt, %37, %44 : vector<8x1xi32>
    %c0_18 = arith.constant 0 : index
    %c0_19 = arith.constant 0 : index
    %46 = vector.load %arg11[%c0_18, %c0_19] : memref<8x1xf32, #tpu.memory_space<vmem>>, vector<8x1xf32>
    %47 = arith.select %45, %43, %46 : vector<8x1xi1>, vector<8x1xf32>
    %c0_20 = arith.constant 0 : index
    %c0_21 = arith.constant 0 : index
    %48 = vector.load %arg11[%c0_20, %c0_21] : memref<8x1xf32, #tpu.memory_space<vmem>>, vector<8x1xf32>
    tpu.vector_store %arg11[%c0_20, %c0_21], %47 {strides = array<i32>} : memref<8x1xf32, #tpu.memory_space<vmem>>, vector<8x1xf32>,
    %c0_22 = arith.constant 0 : index
    %c0_23 = arith.constant 0 : index
    %49 = vector.load %arg10[%c0_22, %c0_23] : memref<8x1xi32, #tpu.memory_space<vmem>>, vector<8x1xi32>
    %50 = arith.minsi %49, %37 : vector<8x1xi32>
    %c0_24 = arith.constant 0 : index
    %c0_25 = arith.constant 0 : index
    %51 = vector.load %arg10[%c0_24, %c0_25] : memref<8x1xi32, #tpu.memory_space<vmem>>, vector<8x1xi32>
    tpu.vector_store %arg10[%c0_24, %c0_25], %50 {strides = array<i32>} : memref<8x1xi32, #tpu.memory_space<vmem>>, vector<8x1xi32>,
    %cst_26 = arith.constant 0xFF800000 : f32
    %52 = vector.broadcast %cst_26 : f32 to vector<8x128xf32>
    %53 = arith.select %31, %9, %52 : vector<8x128xi1>, vector<8x128xf32>
    %cst_27 = arith.constant dense<0xFF800000> : vector<8xf32>
    %54 = vector.multi_reduction <maximumf>, %53, %cst_27 [1] : vector<8x128xf32> to vector<8xf32>
    %55 = vector.shape_cast %54 : vector<8xf32> to vector<8x1xf32>
    %c0_28 = arith.constant 0 : index
    %c0_29 = arith.constant 0 : index
    %56 = vector.load %arg8[%c0_28, %c0_29] : memref<8x1xf32, #tpu.memory_space<vmem>>, vector<8x1xf32>
    %57 = arith.maximumf %56, %55 : vector<8x1xf32>
    %c0_30 = arith.constant 0 : index
    %c0_31 = arith.constant 0 : index
    %58 = vector.load %arg9[%c0_30, %c0_31] : memref<8x1xf32, #tpu.memory_space<vmem>>, vector<8x1xf32>
    %59 = arith.subf %56, %57 : vector<8x1xf32>
    %60 = math.exp %59 : vector<8x1xf32>
    %61 = arith.mulf %58, %60 : vector<8x1xf32>
    %62 = vector.broadcast %57 : vector<8x1xf32> to vector<8x128xf32>
    %63 = arith.subf %53, %62 : vector<8x128xf32>
    %64 = math.exp %63 : vector<8x128xf32>
    %cst_32 = arith.constant dense<0.000000e+00> : vector<8xf32>
    %65 = vector.multi_reduction <add>, %64, %cst_32 [1] : vector<8x128xf32> to vector<8xf32>
    %66 = vector.shape_cast %65 : vector<8xf32> to vector<8x1xf32>
    %67 = arith.addf %61, %66 : vector<8x1xf32>
    %c0_33 = arith.constant 0 : index
    %c0_34 = arith.constant 0 : index
    %68 = vector.load %arg9[%c0_33, %c0_34] : memref<8x1xf32, #tpu.memory_space<vmem>>, vector<8x1xf32>
    tpu.vector_store %arg9[%c0_33, %c0_34], %67 {strides = array<i32>} : memref<8x1xf32, #tpu.memory_space<vmem>>, vector<8x1xf32>,
    %c0_35 = arith.constant 0 : index
    %c0_36 = arith.constant 0 : index
    %69 = vector.load %arg8[%c0_35, %c0_36] : memref<8x1xf32, #tpu.memory_space<vmem>>, vector<8x1xf32>
    tpu.vector_store %arg8[%c0_35, %c0_36], %57 {strides = array<i32>} : memref<8x1xf32, #tpu.memory_space<vmem>>, vector<8x1xf32>,
    %c0_i32_37 = arith.constant 0 : i32
    %70 = arith.cmpi eq, %arg1, %c0_i32_37 : i32
    %71 = arith.extui %70 : i1 to i32
    %c0_i32_38 = arith.constant 0 : i32
    %72 = arith.cmpi ne, %71, %c0_i32_38 : i32
    scf.if %72 {
      %c0_39 = arith.constant 0 : index
      %c0_40 = arith.constant 0 : index
      %73 = vector.load %arg11[%c0_39, %c0_40] : memref<8x1xf32, #tpu.memory_space<vmem>>, vector<8x1xf32>
      %c0_41 = arith.constant 0 : index
      %c0_42 = arith.constant 0 : index
      %74 = vector.load %arg8[%c0_41, %c0_42] : memref<8x1xf32, #tpu.memory_space<vmem>>, vector<8x1xf32>
      %c0_43 = arith.constant 0 : index
      %c0_44 = arith.constant 0 : index
      %75 = vector.load %arg9[%c0_43, %c0_44] : memref<8x1xf32, #tpu.memory_space<vmem>>, vector<8x1xf32>
      %c0_45 = arith.constant 0 : index
      %c0_46 = arith.constant 0 : index
      %76 = vector.load %arg4[%c0_45, %c0_46] : memref<8x1xf32, #tpu.memory_space<vmem>>, vector<8x1xf32>
      %cst_47 = arith.constant 1.400000e+01 : f32
      %77 = vector.broadcast %cst_47 : f32 to vector<8x1xf32>
      %78 = arith.subf %77, %76 : vector<8x1xf32>
      %79 = arith.maximumf %74, %73 : vector<8x1xf32>
      %cst_48 = arith.constant 0.000000e+00 : f32
      %80 = vector.broadcast %cst_48 : f32 to vector<8x1xf32>
      %81 = arith.maximumf %79, %80 : vector<8x1xf32>
      %82 = arith.subf %74, %81 : vector<8x1xf32>
      %83 = math.exp %82 : vector<8x1xf32>
      %84 = arith.mulf %75, %83 : vector<8x1xf32>
      %85 = arith.subf %73, %81 : vector<8x1xf32>
      %86 = math.exp %85 : vector<8x1xf32>
      %87 = arith.addf %84, %86 : vector<8x1xf32>
      %cst_49 = arith.constant 0.000000e+00 : f32
      %88 = vector.broadcast %cst_49 : f32 to vector<8x1xf32>
      %89 = arith.subf %88, %81 : vector<8x1xf32>
      %90 = math.exp %89 : vector<8x1xf32>
      %91 = arith.mulf %78, %90 : vector<8x1xf32>
      %92 = arith.addf %87, %91 : vector<8x1xf32>
      %93 = math.log %92 : vector<8x1xf32>
      %94 = arith.addf %81, %93 : vector<8x1xf32>
      %95 = arith.subf %94, %73 : vector<8x1xf32>
      %c0_50 = arith.constant 0 : index
      %c0_51 = arith.constant 0 : index
      %96 = vector.load %arg7[%c0_50, %c0_51] : memref<8x1xf32, #tpu.memory_space<vmem>>, vector<8x1xf32>
      tpu.vector_store %arg7[%c0_50, %c0_51], %95 {strides = array<i32>} : memref<8x1xf32, #tpu.memory_space<vmem>>, vector<8x1xf32>,
    } else {
    }
    return
  }
  func.func @transform_0(%arg0: i32, %arg1: i32) -> (i32, i32) {
    %c0_i32 = arith.constant 0 : i32
    %c0_i32_0 = arith.constant 0 : i32
    return %arg0, %c0_i32 : i32, i32
  }
  func.func @transform_1(%arg0: i32, %arg1: i32) -> (i32, i32) {
    %c0_i32 = arith.constant 0 : i32
    %c0_i32_0 = arith.constant 0 : i32
    return %c0_i32, %arg1 : i32, i32
  }
  func.func @transform_2(%arg0: i32, %arg1: i32) -> (i32, i32) {
    %c0_i32 = arith.constant 0 : i32
    %c0_i32_0 = arith.constant 0 : i32
    return %arg0, %c0_i32 : i32, i32
  }
  func.func @transform_3(%arg0: i32, %arg1: i32) -> (i32, i32) {
    %c0_i32 = arith.constant 0 : i32
    %c0_i32_0 = arith.constant 0 : i32
    return %arg0, %c0_i32 : i32, i32
  }
  func.func @transform_4(%arg0: i32, %arg1: i32) -> (i32, i32) {
    %c0_i32 = arith.constant 0 : i32
    %c0_i32_0 = arith.constant 0 : i32
    return %c0_i32, %arg1 : i32, i32
  }
  func.func @transform_5(%arg0: i32, %arg1: i32) -> (i32, i32) {
    %c0_i32 = arith.constant 0 : i32
    %c0_i32_0 = arith.constant 0 : i32
    return %arg0, %c0_i32 : i32, i32
  }
}

</mosaic_0001>

<bundles_post_ra>
// kernel: tpu_custom_call.1
= control target key start
LH: loop header
LB: loop body
LE: loop exit
PB: predicated region body
PF: predicated region fallthrough
CT: control target
= control target key end

     0   :  { %10 = vsyncpa [#allocation7], 0  ;;  %s236_s21 = smov [#allocation6]   ;;  %s237_s23 = smov 128   ;;  %s304_s0 = inlined_call_operand.vmem [shape: s32[8,1], index: 0, kind: input, shape index: {}]   ;;  %s305_s1 = inlined_call_operand.vmem [shape: s32[1,128], index: 1, kind: input, shape index: {}]   ;;  %s306_s2 = inlined_call_operand.vmem [shape: f32[8,1], index: 2, kind: input, shape index: {}]   ;;  %s307_s3 = inlined_call_operand.vmem [shape: f32[8,32], index: 3, kind: input, shape index: {}]   ;;  %s308_s4 = inlined_call_operand.hbm [shape: f32[32,128], index: 4, kind: input, shape index: {}]   ;;  %s309_s5 = inlined_call_operand.vmem [shape: f32[8,1], index: 5, kind: output, shape index: {}]  }
   0x1   :  { %s23_s20 = sshll.u32 %s308_s4, 4  ;;  %s25_s22 = sshll.u32 %s236_s21, 4  ;;  %s24_s20 = int_to_ptr.hbm [resolvable:$true] %s23_s20  ;;  %s26_s22 = int_to_ptr.vmem [resolvable:$true] %s25_s22 }
   0x2   :  { %s238_s24 = smov 8  }
   0x3   :  { %31 = dma.hbm_to_vmem [thread:$0]  %s24_s20, 512, %s26_s22, [#allocation7], %s237_s23, %s237_s23, %s238_s24  }
   0x4   :  { %234 = dma.done.wait [#allocation7], 512  }
   0x5   :  { %235 = vsyncadd [#allocation7], 4294966784  ;;  %v239_v0 = vmov 0   ;;  %v86_v1 = vld [vmem:[%s304_s0] sm:$0xff]  ;;  %v49_v2 = vld [vmem:[#allocation6 + $0x18] sm:$0xff]  ;;  %vm50_vm0 = vcmask 261120   ;;  %v77_v7 = vlaneseq }
   0x6   :  { %195 = vset.pattern.permute.xlu0 %v239_v0  ;;  %196 = vset.pattern.permute.xlu2 %v239_v0  ;;  %v48_v3 = vld [vmem:[#allocation6 + $0x10] sm:$0xff]  ;;  %v47_v4 = vld [vmem:[#allocation6 + $0x8] sm:$0xff]  ;;  %v46_v5 = vld [vmem:[#allocation6] sm:$0xff]  ;;  %vm240_vm5 = vmmov 1   ;;  %vm40_vm9 = vcmask 7168   ;;  %v242_v23 = vmov 0.0  }
   0x7   :  { %90 = vperm.xlu0 %195, %v86_v1   ;;  %66 = vmatpush.msra.mxu0 %v49_v2  ;;  %v45_v6 = vld [vmem:[%s307_s3] sm:$0xff]  ;;  %v78_v8 = vshrl.u32 %v77_v7, 7  ;;  %v83_v9 = vand.u32 127, %v77_v7  ;;  %v241_v22 = vmov -1e+30   ;;  %42 = vst.msk [vmem:[#allocation3] sm:$0xff] %vm40_vm9, %v242_v23 }
   0x8   :  { %v197_v10 = vld [vmem:[%s305_s1] ss:$0 sm:$0xff]  ;;  %41 = vst.msk [vmem:[#allocation2] sm:$0xff] %vm40_vm9, %v241_v22  ;;  %v243_v32 = vmov 8  }
   0x9   :  { %67 = vmatpush.msra.mxu0 %v48_v3  ;;  %vm94_vm1 = vcmp.ne.s32.totalorder %v78_v8, %v83_v9  ;;  %v87_v14 = vld [vmem:[%s305_s1] sm:$0x1]  ;;  %44 = vst.msk [vmem:[#allocation5] sm:$0xff] %vm40_vm9, %v242_v23 }
   0xa   :  { %vm88_vm4 = vcmp.ge.s32.totalorder %v87_v14, 0  ;;  %43 = vst.msk [vmem:[#allocation4] sm:$0xff] %vm40_vm9, %v243_v32 }
   0xb   :  { %68 = vmatpush.msra.mxu0 %v47_v4  ;;  %v97_v16 = vsel %vm88_vm4, 1, %v239_v0  ;;  %v159_v0 = vld [vmem:[%s306_s2] sm:$0xff] }
   0xc   :  { %v98_v17 = vperm.slane %v97_v16, 0  ;;  %v160_v1 = vsub.f32 14.0, %v159_v0 }
   0xd   :  { %69 = vmatpush.msra.mxu0 %v46_v5 }
   0xe   :  { %186 = vmatmul.msk.f32.vlgmr.msra.gmra.mxu0 %vm50_vm0, %v45_v6  ;;  %vm99_vm7 = vcmp.eq.s32.totalorder %v98_v17, 1  ;;  %v135_v47 = vld [vmem:[#allocation3] sm:$0xff] }
   0xf   :  { %v133_v28 = vld [vmem:[#allocation2] sm:$0xff] }
  0x10   :  { %v122_v51 = vld [vmem:[#allocation5] sm:$0xff] }
  0x11   :  { %v126_v41 = vld [vmem:[#allocation4] sm:$0xff] }
  0x79   :  { %v91_v11 = vpop.permute.xlu0 %90 }
  0x7a   :  { %vm93_vm2 = vcmp.eq.s32.totalorder %v91_v11, %v197_v10 }
  0x7b   :  { %vm95_vm3 = vmand %vm93_vm2, %vm94_vm1 }
  0x7c   :  { %v101_v12 = vsel %vm95_vm3, %v83_v9, 8  ;;  %vm96_vm6 = vmxor %vm93_vm2, %vm240_vm5 }
  0x7d   :  { %v103_v13 = vshra.s32 %v101_v12, 16  ;;  %vm100_vm8 = vmand %vm96_vm6, %vm99_vm7  ;;  %v102_v24 = vand.u32 65535, %v101_v12 }
  0x7f   :  { %v105_v15 = vcvt.s32.f32 %v103_v13  ;;  %v104_v26 = vcvt.s32.f32 %v102_v24 }
  0x81   :  { %106 = vmin.xlane.f32.xlu0 %v105_v15 }
  0x8b   :  { %v71_v18 = vpop.f32.mrf.mxu0 }
  0x8c   :  { %v74_v19 = vmul.f32 0.25, %v71_v18 }
  0x8e   :  { %v75_v20 = vadd.f32 0.25, %v74_v19 }
  0x90   :  { %v130_v21 = vsel %vm100_vm8, %v75_v20, -inf }
  0x91   :  { %131 = vmax.xlane.f32.xlu1 %v130_v21 }
  0xf4   :  { %v107_v25 = vpop.xlane.xlu0 %106 }
  0xf5   :  { %vm108_vm10 = vcmp.eq.f32.partialorder %v105_v15, %v107_v25  ;;  %v113_v36 = vcvt.f32.s32 %v107_v25 }
  0xf6   :  { %v109_v27 = vsel %vm108_vm10, %v104_v26, inf }
  0xf7   :  { %110 = vmin.xlane.f32.xlu1 %v109_v27  ;;  %v114_v38 = vshll.u32 %v113_v36, 16 }
 0x104   :  { %v132_v29 = vpop.xlane.xlu1 %131 }
 0x105   :  { %v134_v30 = vmax.f32 %v133_v28, %v132_v29 }
 0x107   :  { %v136_v31 = vsub.f32 %v133_v28, %v134_v30  ;;  %152 = vst.msk [vmem:[#allocation2] sm:$0xff] %vm40_vm9, %v134_v30  ;;  %142 = vperm.xlu2 %196, %v134_v30  }
 0x109   :  { %v137_v45 = vmul.f32 1.442695, %v136_v31 }
 0x10e   :  { %v157_v54 = vld [vmem:[#allocation2] sm:$0xff] }
 0x161   :  { %v143_v33 = vpop.permute.xlu2 %142 }
 0x162   :  { %v145_v34 = vsub.f32 %v130_v21, %v143_v33 }
 0x164   :  { %v146_v35 = vmul.f32 1.442695, %v145_v34 }
 0x166   :  { %198 = vpow2.f32 %v146_v35 }
 0x167   :  { %200 = vpow2.f32 %v137_v45 }
 0x16a   :  { %v111_v37 = vpop.xlane.xlu1 %110 }
 0x16b   :  { %v112_v39 = vcvt.f32.s32 %v111_v37 }
 0x16c   :  { %v199_v40 = vpop.eup %198 }
 0x16d   :  { %v115_v42 = vadd.s32 %v114_v38, %v112_v39  ;;  %148 = vadd.xlane.f32.xlu1 %v199_v40  ;;  %v201_v46 = vpop.eup %200 }
 0x16e   :  { %v139_v48 = vmul.f32 %v201_v46, %v135_v47 }
 0x16f   :  { %vm127_vm11 = vcmp.lt.s32.totalorder %v126_v41, %v115_v42  ;;  %vm116_vm12 = vcmp.eq.s32.totalorder %v101_v12, %v115_v42  ;;  %vm121_vm13 = vcmp.lt.s32.totalorder %v115_v42, %v126_v41 }
 0x170   :  { %v128_v43 = vsel %vm127_vm11, %v126_v41, %v115_v42  ;;  %v117_v44 = vsel %vm116_vm12, %v75_v20, 0.0 }
 0x171   :  { %118 = vadd.xlane.f32.xlu2 %v117_v44  ;;  %129 = vst.msk [vmem:[#allocation4] sm:$0xff] %vm40_vm9, %v128_v43 }
 0x1e0   :  { %v149_v49 = vpop.xlane.xlu1 %148 }
 0x1e1   :  { %v150_v50 = vadd.f32 %v149_v49, %v139_v48 }
 0x1e3   :  { %151 = vst.msk [vmem:[#allocation3] sm:$0xff] %vm40_vm9, %v150_v50 }
 0x1e4   :  { %v119_v52 = vpop.xlane.xlu2 %118 }
 0x1e5   :  { %v123_v53 = vsel %vm121_vm13, %v119_v52, %v122_v51 }
 0x1e6   :  { %125 = vst.msk [vmem:[#allocation5] sm:$0xff] %vm40_vm9, %v123_v53 }
 0x1ea   :  { %v158_v3 = vld [vmem:[#allocation3] sm:$0xff] }
 0x1ed   :  { %v156_v55 = vld [vmem:[#allocation5] sm:$0xff] }
 0x1ee   :  { %v161_v56 = vmax.f32 %v157_v54, %v156_v55 }
 0x1f0   :  { %v162_v57 = vmax.f32 %v161_v56, 0.0 }
 0x1f2   :  { %v163_v58 = vsub.f32 %v157_v54, %v162_v57  ;;  %v167_v59 = vsub.f32 %v156_v55, %v162_v57  ;;  %v171_v60 = vsub.f32 0.0, %v162_v57 }
 0x1f4   :  { %v164_v61 = vmul.f32 1.442695, %v163_v58  ;;  %v168_v62 = vmul.f32 1.442695, %v167_v59  ;;  %v172_v63 = vmul.f32 1.442695, %v171_v60 }
 0x1f6   :  { %202 = vpow2.f32 %v164_v61 }
 0x1f7   :  { %204 = vpow2.f32 %v168_v62 }
 0x1f8   :  { %206 = vpow2.f32 %v172_v63 }
 0x1fc   :  { %v203_v2 = vpop.eup %202 }
 0x1fd   :  { %v205_v4 = vpop.eup %204  ;;  %v166_v5 = vmul.f32 %v203_v2, %v158_v3 }
 0x1fe   :  { %v207_v6 = vpop.eup %206 }
 0x1ff   :  { %v170_v7 = vadd.f32 %v205_v4, %v166_v5  ;;  %v174_v8 = vmul.f32 %v207_v6, %v160_v1 }
 0x201   :  { %v175_v9 = vadd.f32 %v174_v8, %v170_v7 }
 0x203   :  { %208 = vlog2.f32 %v175_v9 }
 0x209   :  { %v209_v10 = vpop.eup %208 }
 0x20a   :  { %v177_v11 = vmul.f32 0.6931472, %v209_v10 }
 0x20c   :  { %v178_v12 = vadd.f32 %v177_v11, %v162_v57 }
 0x20e   :  { %v179_v13 = vsub.f32 %v178_v12, %v156_v55 }
 0x210   :  { %180 = vst.msk [vmem:[%s309_s5] sm:$0xff] %vm40_vm9, %v179_v13 }
 0x211   :  { %185 = vsyncpa [#allocation7], 1 }

</bundles_post_ra>
